<compile_context>
chip_gen: v5e
topology: v5e:2x2
jax: 0.10.0
libtpu: 0.0.40
codegen_flags: <defaults>
</compile_context>

<pallas_src>
import functools

import jax
import jax.numpy as jnp
from jax import lax
from jax.experimental import pallas as pl
from jax.experimental.pallas import tpu as pltpu


def _film_kernel(x_ref, halo_ref, w1_ref, b1_ref, w23_ref, b23_ref,
                 scale_ref, shift_ref, *, C, Tt, T_true):
    """One (batch, T-tile) block per grid step, native (C, T) layout.

    x_ref    : (1, C, Tt)    input tile
    halo_ref : (1, 1, C, 4)  columns [t0-2, t0-1, t0+Tt, t0+Tt+1] of x (0 outside)
    w1_ref   : (C, 3C)       first conv, the 3 taps flattened into K
    b1_ref   : (C, 1)
    w23_ref  : (2C, 3C)      scale conv (rows :C) and shift conv (rows C:) fused
    b23_ref  : (2C, 1)
    scale_ref, shift_ref : (1, C, Tt)
    """
    j = pl.program_id(1)                                   # T-tile index

    x = x_ref[0]                                           # (C, Tt)
    halo = halo_ref[0, 0]                                  # (C, 4)
    x_ext = jnp.concatenate([halo[:, 0:2], x, halo[:, 2:4]],
                            axis=-1)                       # (C, Tt + 4)

    mxu_dtype = w1_ref.dtype

    # ---- conv1 (k=3, "same") as one matmul via im2col: K = 3C --------------
    x_cols = jnp.concatenate(
        [x_ext[:, 0:Tt + 2], x_ext[:, 1:Tt + 3], x_ext[:, 2:Tt + 4]],
        axis=0).astype(mxu_dtype)                          # (3C, Tt + 2)
    h = jnp.dot(w1_ref[...], x_cols,
                preferred_element_type=jnp.float32) + b1_ref[...]
    h = jnp.where(h >= 0.0, h, 0.2 * h)                    # LeakyReLU(0.2), f32

    # h outside the true signal [0, T) must be zero for the second conv's
    # "same" padding (also kills any padded tail columns of the last tile).
    gcol = lax.broadcasted_iota(jnp.int32, (1, Tt + 2), 1) + (j * Tt - 1)
    h = jnp.where((gcol >= 0) & (gcol < T_true), h, 0.0)   # (C, Tt + 2)

    # ---- scale & shift convs fused: one (2C, 3C) x (3C, Tt) matmul ---------
    h_cols = jnp.concatenate(
        [h[:, 0:Tt], h[:, 1:Tt + 1], h[:, 2:Tt + 2]],
        axis=0).astype(mxu_dtype)                          # (3C, Tt)
    out = jnp.dot(w23_ref[...], h_cols,
                  preferred_element_type=jnp.float32) + b23_ref[...]  # (2C, Tt)

    scale_ref[0] = out[:C, :].astype(scale_ref.dtype)
    shift_ref[0] = out[C:, :].astype(shift_ref.dtype)


_MAX_T_TILE = 512   # lane-axis tile; comfortably inside every generation's VMEM


@functools.partial(jax.jit, static_argnames=("mxu_dtype",))
def fastsvc_film_net(x_bct, params, mxu_dtype=None):
    """FastSVC FiLM block.

    Args:
      x_bct:  (B, C, T) input, PyTorch NCT convention.
      params: dict with 'w'/'b', 'w_scale'/'b_scale', 'w_shift'/'b_shift'
              (weights shaped (C, C, 3), biases (C,)).
      mxu_dtype: optional dtype (e.g. jnp.bfloat16) for MXU operands on
              v6e/v7x; accumulation / LeakyReLU stay f32.
    Returns:
      (scale, shift), each (B, C, T).
    """
    B, C, T = x_bct.shape
    out_dtype = x_bct.dtype

    # ---- T tiling -----------------------------------------------------------
    if T <= _MAX_T_TILE:
        Tt, nT = T, 1
    else:
        Tt = _MAX_T_TILE
        nT = -(-T // Tt)
    Tp = nT * Tt

    x = x_bct if mxu_dtype is None else x_bct.astype(mxu_dtype)
    if Tp != T:
        x = jnp.pad(x, ((0, 0), (0, 0), (0, Tp - T)))       # zero tail

    # Halos: for tile j, the 2 columns just left of it and just right of it
    # (zeros outside the signal).  Tiny tensor -> x read from HBM only once.
    xe = jnp.pad(x, ((0, 0), (0, 0), (2, 2)))                # (B, C, Tp + 4)
    halos = jnp.stack(
        [jnp.concatenate([xe[:, :, j * Tt:j * Tt + 2],
                          xe[:, :, (j + 1) * Tt + 2:(j + 1) * Tt + 4]],
                         axis=-1)
         for j in range(nT)],
        axis=1)                                              # (B, nT, C, 4)

    # ---- fuse weights once in the wrapper -----------------------------------
    w_dtype = x.dtype

    def fuse_taps(w):   # (C_out, C_in, 3) -> (C_out, 3*C_in), tap-major along K
        return jnp.transpose(w, (0, 2, 1)).reshape(w.shape[0], 3 * w.shape[1])

    w1 = fuse_taps(params['w']).astype(w_dtype)                       # (C, 3C)
    w23 = jnp.concatenate([fuse_taps(params['w_scale']),
                           fuse_taps(params['w_shift'])],
                          axis=0).astype(w_dtype)                     # (2C, 3C)
    b1 = params['b'].reshape(C, 1).astype(jnp.float32)
    b23 = jnp.concatenate([params['b_scale'], params['b_shift']]
                          ).reshape(2 * C, 1).astype(jnp.float32)

    kernel = functools.partial(_film_kernel, C=C, Tt=Tt, T_true=T)

    tile_spec = pl.BlockSpec((1, C, Tt), lambda b, j: (b, 0, j))
    # NOTE: on v7x with very large C one could additionally pass
    # pipeline_mode=pl.Buffered(1) on the constant weight specs to reclaim the
    # second buffer; negligible at these sizes so omitted for portability.
    scale, shift = pl.pallas_call(
        kernel,
        out_shape=(jax.ShapeDtypeStruct((B, C, Tp), out_dtype),
                   jax.ShapeDtypeStruct((B, C, Tp), out_dtype)),
        grid_spec=pltpu.PrefetchScalarGridSpec(
            num_scalar_prefetch=0,
            grid=(B, nT),
            in_specs=[
                tile_spec,                                            # x
                pl.BlockSpec((1, 1, C, 4), lambda b, j: (b, j, 0, 0)),  # halos
                pl.BlockSpec((C, 3 * C), lambda b, j: (0, 0)),        # w1
                pl.BlockSpec((C, 1), lambda b, j: (0, 0)),            # b1
                pl.BlockSpec((2 * C, 3 * C), lambda b, j: (0, 0)),    # w23
                pl.BlockSpec((2 * C, 1), lambda b, j: (0, 0)),        # b23
            ],
            out_specs=(tile_spec, tile_spec),
        ),
        compiler_params=pltpu.CompilerParams(
            dimension_semantics=("parallel", "parallel"),
            vmem_limit_bytes=48 * 1024 * 1024),
    )(x, halos, w1, b1, w23, b23)

    if Tp != T:
        scale = scale[:, :, :T]
        shift = shift[:, :, :T]
    return scale, shift


# ----------------------------- reference (pure JAX) -----------------------------

def _ref_conv1d(x_bct, w, b):
    """Conv1d kernel=3, padding=1, dilation=1; x (B,C,T), w (Co,Ci,3), b (Co,)."""
    B, C, T = x_bct.shape
    xp = jnp.pad(x_bct, ((0, 0), (0, 0), (1, 1)))
    out = b[None, :, None]
    for k in range(3):
        out = out + jnp.einsum('oi,bit->bot', w[:, :, k], xp[:, :, k:k + T])
    return out


def _ref_forward(x_bct, p):
    h = _ref_conv1d(x_bct, p['w'], p['b'])
    h = jnp.where(h >= 0.0, h, 0.2 * h)
    scale = _ref_conv1d(h, p['w_scale'], p['b_scale'])
    shift = _ref_conv1d(h, p['w_shift'], p['b_shift'])
    return scale, shift


# ------------------------------------ main ------------------------------------

if __name__ == "__main__":
    B, C, T = 2, 32, 16     # batch, mid_channels, time
    key = jax.random.PRNGKey(0)
    k_x, k_w1, k_b1, k_ws, k_bs, k_wt, k_bt = jax.random.split(key, 7)

    # Deterministic init mimicking PyTorch Conv1d default (uniform +-1/sqrt(Cin*k)).
    bound = 1.0 / (C * 3) ** 0.5
    params = {
        'w':       jax.random.uniform(k_w1, (C, C, 3), jnp.float32, -bound, bound),
        'b':       jax.random.uniform(k_b1, (C,),      jnp.float32, -bound, bound),
        'w_scale': jax.random.uniform(k_ws, (C, C, 3), jnp.float32, -bound, bound),
        'b_scale': jax.random.uniform(k_bs, (C,),      jnp.float32, -bound, bound),
        'w_shift': jax.random.uniform(k_wt, (C, C, 3), jnp.float32, -bound, bound),
        'b_shift': jax.random.uniform(k_bt, (C,),      jnp.float32, -bound, bound),
    }
    x = jax.random.normal(k_x, (B, C, T), jnp.float32)

    scale, shift = fastsvc_film_net(x, params)
    jax.block_until_ready((scale, shift))

    ref_scale, ref_shift = _ref_forward(x, params)
    assert scale.shape == (B, C, T) and shift.shape == (B, C, T)
    assert jnp.allclose(scale, ref_scale, atol=2e-4, rtol=2e-4)
    assert jnp.allclose(shift, ref_shift, atol=2e-4, rtol=2e-4)

    print("KERNEL_OK")
</pallas_src>

<mosaic_0001>
module attributes {stable_mosaic.version = 11 : i64} {
  func.func @_film_kernel(%arg0: i32, %arg1: i32, %arg2: memref<1x32x16xf32, #tpu.memory_space<vmem>>, %arg3: memref<1x1x32x4xf32, #tpu.memory_space<vmem>>, %arg4: memref<32x96xf32, #tpu.memory_space<vmem>>, %arg5: memref<32x1xf32, #tpu.memory_space<vmem>>, %arg6: memref<64x96xf32, #tpu.memory_space<vmem>>, %arg7: memref<64x1xf32, #tpu.memory_space<vmem>>, %arg8: memref<1x32x16xf32, #tpu.memory_space<vmem>>, %arg9: memref<1x32x16xf32, #tpu.memory_space<vmem>>) attributes {dimension_semantics = [#tpu.dimension_semantics<parallel>, #tpu.dimension_semantics<parallel>], iteration_bounds = array<i64: 2, 1>, scalar_prefetch = 0 : i64, scratch_operands = 0 : i64, tpu.core_type = #tpu.core_type<tc>, window_params = [{transform_indices = @transform_0, window_bounds = array<i64: 1, 32, 16>}, {transform_indices = @transform_1, window_bounds = array<i64: 1, 1, 32, 4>}, {pipeline_mode = #tpu.pipeline_mode<synchronous>, transform_indices = @transform_2, window_bounds = array<i64: 32, 96>}, {pipeline_mode = #tpu.pipeline_mode<synchronous>, transform_indices = @transform_3, window_bounds = array<i64: 32, 1>}, {pipeline_mode = #tpu.pipeline_mode<synchronous>, transform_indices = @transform_4, window_bounds = array<i64: 64, 96>}, {pipeline_mode = #tpu.pipeline_mode<synchronous>, transform_indices = @transform_5, window_bounds = array<i64: 64, 1>}, {transform_indices = @transform_6, window_bounds = array<i64: 1, 32, 16>}, {transform_indices = @transform_7, window_bounds = array<i64: 1, 32, 16>}]} {
    %c0 = arith.constant 0 : index
    %c0_0 = arith.constant 0 : index
    %c0_1 = arith.constant 0 : index
    %0 = vector.load %arg2[%c0, %c0_0, %c0_1] : memref<1x32x16xf32, #tpu.memory_space<vmem>>, vector<1x32x16xf32>
    %1 = vector.shape_cast %0 : vector<1x32x16xf32> to vector<32x16xf32>
    %c0_2 = arith.constant 0 : index
    %c0_3 = arith.constant 0 : index
    %c0_4 = arith.constant 0 : index
    %c0_5 = arith.constant 0 : index
    %2 = vector.load %arg3[%c0_2, %c0_3, %c0_4, %c0_5] : memref<1x1x32x4xf32, #tpu.memory_space<vmem>>, vector<1x1x32x4xf32>
    %3 = vector.shape_cast %2 : vector<1x1x32x4xf32> to vector<32x4xf32>
    %4 = vector.extract_strided_slice %3 {offsets = [0, 0], sizes = [32, 2], strides = [1, 1]} : vector<32x4xf32> to vector<32x2xf32>
    %5 = vector.extract_strided_slice %3 {offsets = [0, 2], sizes = [32, 2], strides = [1, 1]} : vector<32x4xf32> to vector<32x2xf32>
    %6 = tpu.concatenate %4, %1, %5 in 1 : vector<32x2xf32>, vector<32x16xf32>, vector<32x2xf32> -> vector<32x20xf32>
    %7 = vector.extract_strided_slice %6 {offsets = [0, 0], sizes = [32, 18], strides = [1, 1]} : vector<32x20xf32> to vector<32x18xf32>
    %8 = vector.extract_strided_slice %6 {offsets = [0, 1], sizes = [32, 18], strides = [1, 1]} : vector<32x20xf32> to vector<32x18xf32>
    %9 = vector.extract_strided_slice %6 {offsets = [0, 2], sizes = [32, 18], strides = [1, 1]} : vector<32x20xf32> to vector<32x18xf32>
    %10 = tpu.concatenate %7, %8, %9 in 0 : vector<32x18xf32>, vector<32x18xf32>, vector<32x18xf32> -> vector<96x18xf32>
    %c0_6 = arith.constant 0 : index
    %c0_7 = arith.constant 0 : index
    %11 = vector.load %arg4[%c0_6, %c0_7] : memref<32x96xf32, #tpu.memory_space<vmem>>, vector<32x96xf32>
    %cst = arith.constant dense<0.000000e+00> : vector<32x18xf32>
    %12 = tpu.matmul %11, %10, %cst {dimension_numbers = #tpu.dot_dimension_numbers<[1], [0], [0], [1], [0, 0, 1, 1], [], []>} : vector<32x96xf32>, vector<96x18xf32>, vector<32x18xf32> -> vector<32x18xf32>
    %c0_8 = arith.constant 0 : index
    %c0_9 = arith.constant 0 : index
    %13 = vector.load %arg5[%c0_8, %c0_9] : memref<32x1xf32, #tpu.memory_space<vmem>>, vector<32x1xf32>
    %14 = vector.broadcast %13 : vector<32x1xf32> to vector<32x18xf32>
    %15 = arith.addf %12, %14 : vector<32x18xf32>
    %cst_10 = arith.constant 0.000000e+00 : f32
    %16 = vector.broadcast %cst_10 : f32 to vector<32x18xf32>
    %17 = arith.cmpf oge, %15, %16 : vector<32x18xf32>
    %cst_11 = arith.constant 2.000000e-01 : f32
    %18 = vector.broadcast %cst_11 : f32 to vector<32x18xf32>
    %19 = arith.mulf %18, %15 : vector<32x18xf32>
    %20 = arith.select %17, %15, %19 : vector<32x18xi1>, vector<32x18xf32>
    %21 = tpu.iota {dimensions = array<i32: 1>} : vector<1x18xi32>
    %c16_i32 = arith.constant 16 : i32
    %22 = arith.muli %arg1, %c16_i32 : i32
    %c1_i32 = arith.constant 1 : i32
    %23 = arith.subi %22, %c1_i32 : i32
    %24 = vector.broadcast %23 : i32 to vector<1x18xi32>
    %25 = arith.addi %21, %24 : vector<1x18xi32>
    %c0_i32 = arith.constant 0 : i32
    %26 = vector.broadcast %c0_i32 : i32 to vector<1x18xi32>
    %27 = arith.cmpi sge, %25, %26 : vector<1x18xi32>
    %c16_i32_12 = arith.constant 16 : i32
    %28 = vector.broadcast %c16_i32_12 : i32 to vector<1x18xi32>
    %29 = arith.cmpi slt, %25, %28 : vector<1x18xi32>
    %30 = arith.andi %27, %29 : vector<1x18xi1>
    %cst_13 = arith.constant 0.000000e+00 : f32
    %31 = vector.shape_cast %30 : vector<1x18xi1> to vector<1x18xi1>
    %32 = vector.broadcast %31 : vector<1x18xi1> to vector<32x18xi1>
    %33 = vector.broadcast %cst_13 : f32 to vector<32x18xf32>
    %34 = arith.select %32, %20, %33 : vector<32x18xi1>, vector<32x18xf32>
    %35 = vector.extract_strided_slice %34 {offsets = [0, 0], sizes = [32, 16], strides = [1, 1]} : vector<32x18xf32> to vector<32x16xf32>
    %36 = vector.extract_strided_slice %34 {offsets = [0, 1], sizes = [32, 16], strides = [1, 1]} : vector<32x18xf32> to vector<32x16xf32>
    %37 = vector.extract_strided_slice %34 {offsets = [0, 2], sizes = [32, 16], strides = [1, 1]} : vector<32x18xf32> to vector<32x16xf32>
    %38 = tpu.concatenate %35, %36, %37 in 0 : vector<32x16xf32>, vector<32x16xf32>, vector<32x16xf32> -> vector<96x16xf32>
    %c0_14 = arith.constant 0 : index
    %c0_15 = arith.constant 0 : index
    %39 = vector.load %arg6[%c0_14, %c0_15] : memref<64x96xf32, #tpu.memory_space<vmem>>, vector<64x96xf32>
    %cst_16 = arith.constant dense<0.000000e+00> : vector<64x16xf32>
    %40 = tpu.matmul %39, %38, %cst_16 {dimension_numbers = #tpu.dot_dimension_numbers<[1], [0], [0], [1], [0, 0, 1, 1], [], []>} : vector<64x96xf32>, vector<96x16xf32>, vector<64x16xf32> -> vector<64x16xf32>
    %c0_17 = arith.constant 0 : index
    %c0_18 = arith.constant 0 : index
    %41 = vector.load %arg7[%c0_17, %c0_18] : memref<64x1xf32, #tpu.memory_space<vmem>>, vector<64x1xf32>
    %42 = vector.broadcast %41 : vector<64x1xf32> to vector<64x16xf32>
    %43 = arith.addf %40, %42 : vector<64x16xf32>
    %44 = vector.extract_strided_slice %43 {offsets = [0, 0], sizes = [32, 16], strides = [1, 1]} : vector<64x16xf32> to vector<32x16xf32>
    %c0_19 = arith.constant 0 : index
    %c0_20 = arith.constant 0 : index
    %c0_21 = arith.constant 0 : index
    %45 = vector.load %arg8[%c0_19, %c0_20, %c0_21] : memref<1x32x16xf32, #tpu.memory_space<vmem>>, vector<1x32x16xf32>
    %46 = vector.shape_cast %45 : vector<1x32x16xf32> to vector<32x16xf32>
    %47 = vector.shape_cast %44 : vector<32x16xf32> to vector<1x32x16xf32>
    tpu.vector_store %arg8[%c0_19, %c0_20, %c0_21], %47 {strides = array<i32>} : memref<1x32x16xf32, #tpu.memory_space<vmem>>, vector<1x32x16xf32>,
    %48 = vector.extract_strided_slice %43 {offsets = [32, 0], sizes = [32, 16], strides = [1, 1]} : vector<64x16xf32> to vector<32x16xf32>
    %c0_22 = arith.constant 0 : index
    %c0_23 = arith.constant 0 : index
    %c0_24 = arith.constant 0 : index
    %49 = vector.load %arg9[%c0_22, %c0_23, %c0_24] : memref<1x32x16xf32, #tpu.memory_space<vmem>>, vector<1x32x16xf32>
    %50 = vector.shape_cast %49 : vector<1x32x16xf32> to vector<32x16xf32>
    %51 = vector.shape_cast %48 : vector<32x16xf32> to vector<1x32x16xf32>
    tpu.vector_store %arg9[%c0_22, %c0_23, %c0_24], %51 {strides = array<i32>} : memref<1x32x16xf32, #tpu.memory_space<vmem>>, vector<1x32x16xf32>,
    return
  }
  func.func @transform_0(%arg0: i32, %arg1: i32) -> (i32, i32, i32) {
    %c0_i32 = arith.constant 0 : i32
    %c0_i32_0 = arith.constant 0 : i32
    return %arg0, %c0_i32, %arg1 : i32, i32, i32
  }
  func.func @transform_1(%arg0: i32, %arg1: i32) -> (i32, i32, i32, i32) {
    %c0_i32 = arith.constant 0 : i32
    %c0_i32_0 = arith.constant 0 : i32
    %c0_i32_1 = arith.constant 0 : i32
    return %arg0, %arg1, %c0_i32, %c0_i32_0 : i32, i32, i32, i32
  }
  func.func @transform_2(%arg0: i32, %arg1: i32) -> (i32, i32) {
    %c0_i32 = arith.constant 0 : i32
    %c0_i32_0 = arith.constant 0 : i32
    %c0_i32_1 = arith.constant 0 : i32
    return %c0_i32, %c0_i32_0 : i32, i32
  }
  func.func @transform_3(%arg0: i32, %arg1: i32) -> (i32, i32) {
    %c0_i32 = arith.constant 0 : i32
    %c0_i32_0 = arith.constant 0 : i32
    %c0_i32_1 = arith.constant 0 : i32
    return %c0_i32, %c0_i32_0 : i32, i32
  }
  func.func @transform_4(%arg0: i32, %arg1: i32) -> (i32, i32) {
    %c0_i32 = arith.constant 0 : i32
    %c0_i32_0 = arith.constant 0 : i32
    %c0_i32_1 = arith.constant 0 : i32
    return %c0_i32, %c0_i32_0 : i32, i32
  }
  func.func @transform_5(%arg0: i32, %arg1: i32) -> (i32, i32) {
    %c0_i32 = arith.constant 0 : i32
    %c0_i32_0 = arith.constant 0 : i32
    %c0_i32_1 = arith.constant 0 : i32
    return %c0_i32, %c0_i32_0 : i32, i32
  }
  func.func @transform_6(%arg0: i32, %arg1: i32) -> (i32, i32, i32) {
    %c0_i32 = arith.constant 0 : i32
    %c0_i32_0 = arith.constant 0 : i32
    return %arg0, %c0_i32, %arg1 : i32, i32, i32
  }
  func.func @transform_7(%arg0: i32, %arg1: i32) -> (i32, i32, i32) {
    %c0_i32 = arith.constant 0 : i32
    %c0_i32_0 = arith.constant 0 : i32
    return %arg0, %c0_i32, %arg1 : i32, i32, i32
  }
}

</mosaic_0001>

<bundles_post_ra>
// kernel: fastsvc_film_net.1
= control target key start
LH: loop header
LB: loop body
LE: loop exit
PB: predicated region body
PF: predicated region fallthrough
CT: control target
= control target key end

     0   :  { %s1069_s24 = smov 0   ;;  %s1071_s25 = smov 0   ;;  %s1268_s0 = inlined_call_operand.vmem [shape: f32[2,32,16], index: 0, kind: input, shape index: {}]   ;;  %s1269_s1 = inlined_call_operand.vmem [shape: f32[2,1,32,4], index: 1, kind: input, shape index: {}]   ;;  %s1270_s2 = inlined_call_operand.vmem [shape: f32[32,96], index: 2, kind: input, shape index: {}]   ;;  %s1271_s3 = inlined_call_operand.vmem [shape: f32[32,1], index: 3, kind: input, shape index: {}]   ;;  %s1272_s4 = inlined_call_operand.vmem [shape: f32[64,96], index: 4, kind: input, shape index: {}]   ;;  %s1273_s5 = inlined_call_operand.vmem [shape: f32[64,1], index: 5, kind: input, shape index: {}]   ;;  %s1274_s6 = inlined_call_operand.vmem [shape: f32[2,32,16], index: 6, kind: output, shape index: {0}]   ;;  %s1275_s7 = inlined_call_operand.vmem [shape: f32[2,32,16], index: 7, kind: output, shape index: {1}]  }
   0x1   :  { %s1073_s26 = smov 0  }
   0x2 LB: > { %s30_s27 = sadd.s32 1, %s1018_s25  ;;  %p853_p0 = scmp.ge.s32.totalorder %s1022_s26, 1  ;;  %s1022_s26 = sphi %s1073_s26, %s18_s26   ;;  %s1018_s25 = sphi %s1071_s25, %s1279_s25   ;;  %s1014_s24 = sphi %s1069_s24, %s1278_s24  }
   0x3   : > { %p32_p1 = scmp.ge.s32.totalorder %s30_s27, 2  ;;  %p277_p2 = scmp.lt.s32.totalorder %s1022_s26, 3 }
   0x5   : > { %s1281_s27 = smov (%p32_p1, %s30_s27), 0  ;;  %p278_p3 = pnand %p853_p0, %p277_p2 }
   0x6   : > { %p332_p4 = scmp.lt.s32.totalorder (!%p278_p3), %s1014_s24, 1  ;;  %s1024_s12 = smov (!%p278_p3), 2  }
   0x7   : > { %281 = sbr.rel (%p278_p3) target bundleno = 728 (0x2d8), region = 44  ;;  %s1025_s13 = smov (!%p278_p3), 16  }
   0x8   : > { %s1026_s14 = smov (!%p278_p3), 127   ;;  %s1027_s15 = smov (!%p278_p3), 126  }
   0xc   : > { %s1283_s24 = smov (!%p332_p4, %s1014_s24), 1  ;;  %vm405_vm0 = vcmask 15360   ;;  %vm410_vm1 = vcmask 146432   ;;  %v448_v43 = vld [vmem:[%s1271_s3 + $0x8] sm:$0xff]  ;;  %v1028_v45 = vmov 0   ;;  %v449_v48 = vld [vmem:[%s1271_s3 + $0x10] sm:$0xff]  ;;  %v525_v56 = vlaneseq }
   0xd   : > { %s1087_s28 = sshll.u32 %s1283_s24, 5  ;;  %979 = vset.pattern.permute.xlu1 %v1028_v45  ;;  %978 = vset.pattern.permute.xlu0 %v1028_v45  ;;  %v450_v49 = vld [vmem:[%s1271_s3 + $0x18] sm:$0xff]  ;;  %v443_v50 = vld [vmem:[%s1270_s2] sm:$0xff]  ;;  %vm471_vm2 = vcmask 785408   ;;  %v444_v52 = vld [vmem:[%s1270_s2 + $0x8] sm:$0xff]  ;;  %vm689_vm10 = vcmask 130048  }
   0xe   : > { %s339_s8 = scalar_lea.vmem %s1268_s0, %s1087_s28  ;;  %s348_s11 = scalar_lea.vmem %s1269_s1, %s1087_s28  ;;  %977 = vset.pattern.permute.xlu2 %v1028_v45  ;;  %v447_v51 = vld [vmem:[%s1271_s3] sm:$0xff]  ;;  %v445_v53 = vld [vmem:[%s1270_s2 + $0x10] sm:$0xff]  ;;  %v446_v54 = vld [vmem:[%s1270_s2 + $0x18] sm:$0xff]  ;;  %v526_v59 = vand.u32 127, %v525_v56 }
   0xf   : > { %v367_v0 = vld [vmem:[%s339_s8 + $0x10] sm:$0xff]  ;;  %v368_v1 = vld [vmem:[%s339_s8 + $0x18] sm:$0xff]  ;;  %v365_v2 = vld [vmem:[%s339_s8] sm:$0xff]  ;;  %s356_s10 = scalar_lea.vmem %s1274_s6, %s1087_s28 }
  0x10   : > { %v937_v3 = vpack.i.bf16 %v367_v0, %v368_v1  ;;  %v366_v4 = vld [vmem:[%s339_s8 + $0x8] sm:$0xff]  ;;  %v371_v6 = vld [vmem:[%s348_s11 + $0x10] sm:$0xff]  ;;  %v372_v7 = vld [vmem:[%s348_s11 + $0x18] sm:$0xff]  ;;  %v530_v61 = vadd.s32 4294967295, %v526_v59 }
  0x11   : > { %v947_v5 = vpack.i.bf16 %v365_v2, %v366_v4  ;;  %v369_v8 = vld [vmem:[%s348_s11] sm:$0xff]  ;;  %v370_v9 = vld [vmem:[%s348_s11 + $0x8] sm:$0xff]  ;;  %v942_v10 = vpack.i.bf16 %v371_v6, %v372_v7 }
  0x12   : > { %938 = vrot.lane.b32.xlu0 %v937_v3, %s1024_s12  ;;  %v952_v11 = vpack.i.bf16 %v369_v8, %v370_v9  ;;  %vm531_vm4 = vcmp.ge.s32.totalorder %v530_v61, 0  ;;  %vm532_vm5 = vcmp.lt.s32.totalorder %v530_v61, 16  ;;  %v572_v45 = vld [vmem:[%s1272_s4 + $0x20] sm:$0xff] }
  0x13   : > { %948 = vrot.lane.b32.xlu1 %v947_v5, %s1024_s12  ;;  %vm1131_vm7 = vmand %vm531_vm4, %vm532_vm5  ;;  %s364_s12 = scalar_lea.vmem %s1275_s7, %s1087_s28 }
  0x1a   : > { %943 = vrot.lane.b32.xlu0 %v942_v10, %s1025_s13 }
  0x1b   : > { %953 = vrot.lane.b32.xlu1 %v952_v11, %s1025_s13 }
  0x84   : > { %v939_v12 = vpop.permute.xlu0 %938 }
  0x85   : > { %v949_v13 = vpop.permute.xlu1 %948  ;;  %v941_v14 = vunpack.i.h.bf16 %v939_v12  ;;  %v940_v15 = vunpack.i.l.bf16 %v939_v12  ;;  %v576_v12 = vld [vmem:[%s1273_s5] sm:$0xff] }
  0x86   : > { %v951_v16 = vunpack.i.h.bf16 %v949_v13  ;;  %v950_v17 = vunpack.i.l.bf16 %v949_v13 }
  0x87   : > { %v408_v22 = vsel %vm405_vm0, %v371_v6, %v941_v14  ;;  %v409_v23 = vsel %vm405_vm0, %v372_v7, %v940_v15 }
  0x88   : > { %v406_v26 = vsel %vm405_vm0, %v369_v8, %v951_v16  ;;  %v407_v27 = vsel %vm405_vm0, %v370_v9, %v950_v17 }
  0x8c   : > { %v944_v18 = vpop.permute.xlu0 %943 }
  0x8d   : > { %v946_v19 = vunpack.i.h.bf16 %v944_v18  ;;  %v945_v20 = vunpack.i.l.bf16 %v944_v18  ;;  %v954_v21 = vpop.permute.xlu1 %953 }
  0x8e   : > { %v956_v24 = vunpack.i.h.bf16 %v954_v21  ;;  %v955_v25 = vunpack.i.l.bf16 %v954_v21 }
  0x8f   : > { %v413_v28 = vsel %vm410_vm1, %v408_v22, %v946_v19  ;;  %v414_v29 = vsel %vm410_vm1, %v409_v23, %v945_v20  ;;  %v579_v22 = vld [vmem:[%s1273_s5 + $0x18] sm:$0xff]  ;;  %v577_v23 = vld [vmem:[%s1273_s5 + $0x8] sm:$0xff] }
  0x90   : > { %v967_v30 = vpack.i.bf16 %v413_v28, %v414_v29  ;;  %v411_v31 = vsel %vm410_vm1, %v406_v26, %v956_v24  ;;  %v412_v32 = vsel %vm410_vm1, %v407_v27, %v955_v25  ;;  %v582_v24 = vld [vmem:[%s1273_s5 + $0x30] sm:$0xff]  ;;  %v580_v25 = vld [vmem:[%s1273_s5 + $0x20] sm:$0xff]  ;;  %v583_v27 = vld [vmem:[%s1273_s5 + $0x38] sm:$0xff] }
  0x91   : > { %v972_v33 = vpack.i.bf16 %v411_v31, %v412_v32  ;;  %v578_v26 = vld [vmem:[%s1273_s5 + $0x10] sm:$0xff] }
  0x92   : > { %968 = vrot.lane.b32.xlu0 %v967_v30, %s1026_s14  ;;  %958 = vrot.lane.b32.xlu2 %v967_v30, %s1027_s15 }
  0x93   : > { %973 = vrot.lane.b32.xlu1 %v972_v33, %s1026_s14 }
  0x9a   : > { %963 = vrot.lane.b32.xlu2 %v972_v33, %s1027_s15  ;;  %463 = vperm.xlu0 %978, %v449_v48   ;;  %v573_v48 = vld [vmem:[%s1272_s4 + $0x28] sm:$0xff] }
  0x9b   : > { %458 = vperm.xlu1 %979, %v448_v43   ;;  %v574_v43 = vld [vmem:[%s1272_s4 + $0x30] sm:$0xff] }
  0xa2   : > { %468 = vperm.xlu2 %977, %v450_v49  }
  0xaa   : > { %453 = vperm.xlu2 %977, %v447_v51  }
  0xec   : > { %v959_v34 = vpop.permute.xlu2 %958 }
  0xed   : > { %v960_v35 = vunpack.i.l.bf16 %v959_v34  ;;  %v961_v36 = vunpack.i.h.bf16 %v959_v34 }
  0xef   : > { %488 = vmatpush.msra.mxu0 %v960_v35 }
  0xf1   : > { %489 = vmatpush.msra.mxu0 %v961_v36 }
  0xf4   : > { %v964_v37 = vpop.permute.xlu2 %963 }
  0xf5   : > { %v965_v38 = vunpack.i.l.bf16 %v964_v37  ;;  %v966_v39 = vunpack.i.h.bf16 %v964_v37 }
  0xf7   : > { %490 = vmatpush.msra.mxu0 %v965_v38 }
  0xf9   : > { %491 = vmatpush.msra.mxu0 %v966_v39 }
  0xfc   : > { %v469_v55 = vpop.permute.xlu2 %468 }
 0x104   : > { %v969_v40 = vpop.permute.xlu0 %968  ;;  %v454_v57 = vpop.permute.xlu2 %453 }
 0x105   : > { %v970_v41 = vunpack.i.l.bf16 %v969_v40  ;;  %v974_v42 = vpop.permute.xlu1 %973  ;;  %v971_v44 = vunpack.i.h.bf16 %v969_v40 }
 0x106   : > { %v975_v46 = vunpack.i.l.bf16 %v974_v42  ;;  %v976_v47 = vunpack.i.h.bf16 %v974_v42  ;;  %v571_v42 = vld [vmem:[%s1272_s4 + $0x18] sm:$0xff] }
 0x107   : > { %492 = vmatpush.msra.mxu0 %v970_v41  ;;  %v568_v41 = vld [vmem:[%s1272_s4] sm:$0xff] }
 0x109   : > { %493 = vmatpush.msra.mxu0 %v971_v44  ;;  %v569_v44 = vld [vmem:[%s1272_s4 + $0x8] sm:$0xff] }
 0x10b   : > { %494 = vmatpush.msra.mxu0 %v975_v46  ;;  %v575_v46 = vld [vmem:[%s1272_s4 + $0x38] sm:$0xff] }
 0x10c   : > { %v464_v9 = vpop.permute.xlu0 %463 }
 0x10d   : > { %495 = vmatpush.msra.mxu0 %v976_v47  ;;  %v459_v62 = vpop.permute.xlu1 %458  ;;  %v570_v47 = vld [vmem:[%s1272_s4 + $0x10] sm:$0xff] }
 0x10f   : > { %496 = vmatpush.msra.mxu0 %v414_v29 }
 0x111   : > { %497 = vmatpush.msra.mxu0 %v413_v28  ;;  %v581_v28 = vld [vmem:[%s1273_s5 + $0x28] sm:$0xff] }
 0x113   : > { %498 = vmatpush.msra.mxu0 %v412_v32 }
 0x115   : > { %499 = vmatpush.msra.mxu0 %v411_v31 }
 0x116   : > { %862 = vmatmul.msk.f32.vlgmr.msra.gmra.mxu0 %vm471_vm2, %v443_v50 }
 0x11e   : > { %863 = vmatmul.msk.f32.gmra.mxu0 %vm471_vm2, %v444_v52 }
 0x126   : > { %864 = vmatmul.msk.f32.gmra.mxu0 %vm471_vm2, %v445_v53 }
 0x12e   : > { %865 = vmatmul.msk.f32.gmra.mxu0 %vm471_vm2, %v446_v54 }
 0x193   : > { %v501_v58 = vpop.f32.mrf.mxu0 }
 0x194   : > { %v502_v60 = vadd.f32 %v501_v58, %v454_v57 }
 0x196   : > { %v517_v63 = vmul.f32 0.2, %v502_v60  ;;  %vm513_vm3 = vcmp.ge.f32.partialorder %v502_v60, 0.0 }
 0x198   : > { %v1129_v2 = vsel %vm513_vm3, %v502_v60, %v517_v63 }
 0x199   : > { %v536_v6 = vsel %vm1131_vm7, %v1129_v2, 0.0 }
 0x19b   : > { %v504_v0 = vpop.f32.mrf.mxu0 }
 0x19c   : > { %v505_v1 = vadd.f32 %v504_v0, %v459_v62 }
 0x19e   : > { %vm514_vm6 = vcmp.ge.f32.partialorder %v505_v1, 0.0  ;;  %v518_v3 = vmul.f32 0.2, %v505_v1 }
 0x1a0   : > { %v1135_v5 = vsel %vm514_vm6, %v505_v1, %v518_v3 }
 0x1a1   : > { %v537_v7 = vsel %vm1131_vm7, %v1135_v5, 0.0 }
 0x1a2   : > { %v985_v8 = vpack.i.bf16 %v536_v6, %v537_v7 }
 0x1a3   : > { %v507_v10 = vpop.f32.mrf.mxu0 }
 0x1a4   : > { %986 = vrot.lane.b32.xlu2 %v985_v8, %s1027_s15  ;;  %v508_v11 = vadd.f32 %v507_v10, %v464_v9 }
 0x1a6   : > { %v519_v13 = vmul.f32 0.2, %v508_v11  ;;  %vm515_vm8 = vcmp.ge.f32.partialorder %v508_v11, 0.0 }
 0x1a8   : > { %v1147_v16 = vsel %vm515_vm8, %v508_v11, %v519_v13 }
 0x1a9   : > { %v538_v19 = vsel %vm1131_vm7, %v1147_v16, 0.0 }
 0x1ab   : > { %v510_v14 = vpop.f32.mrf.mxu0 }
 0x1ac   : > { %v511_v15 = vadd.f32 %v510_v14, %v469_v55  ;;  %586 = vperm.xlu2 %977, %v576_v12  }
 0x1ae   : > { %vm516_vm9 = vcmp.ge.f32.partialorder %v511_v15, 0.0  ;;  %v520_v17 = vmul.f32 0.2, %v511_v15 }
 0x1b0   : > { %v524_v18 = vsel %vm516_vm9, %v511_v15, %v520_v17 }
 0x1b1   : > { %v539_v20 = vsel %vm1131_vm7, %v524_v18, 0.0 }
 0x1b2   : > { %v990_v21 = vpack.i.bf16 %v538_v19, %v539_v20 }
 0x1b4   : > { %991 = vrot.lane.b32.xlu0 %v990_v21, %s1026_s14  ;;  %981 = vrot.lane.b32.xlu1 %v990_v21, %s1027_s15 }
 0x1b5   : > { %601 = vperm.xlu2 %977, %v579_v22  }
 0x1bc   : > { %591 = vperm.xlu0 %978, %v577_v23   ;;  %996 = vrot.lane.b32.xlu1 %v985_v8, %s1026_s14 }
 0x1bd   : > { %616 = vperm.xlu2 %977, %v582_v24  }
 0x1c4   : > { %606 = vperm.xlu0 %978, %v580_v25   ;;  %596 = vperm.xlu1 %979, %v578_v26  }
 0x1cc   : > { %621 = vperm.xlu0 %978, %v583_v27   ;;  %611 = vperm.xlu1 %979, %v581_v28  }
 0x1fe   : > { %v987_v31 = vpop.permute.xlu2 %986 }
 0x1ff   : > { %v988_v33 = vunpack.i.l.bf16 %v987_v31  ;;  %v989_v35 = vunpack.i.h.bf16 %v987_v31 }
 0x206   : > { %v587_v49 = vpop.permute.xlu2 %586 }
 0x20f   : > { %v602_v51 = vpop.permute.xlu2 %601 }
 0x217   : > { %v617_v55 = vpop.permute.xlu2 %616 }
 0x226   : > { %v982_v29 = vpop.permute.xlu1 %981  ;;  %v992_v34 = vpop.permute.xlu0 %991 }
 0x227   : > { %v983_v30 = vunpack.i.l.bf16 %v982_v29  ;;  %v984_v32 = vunpack.i.h.bf16 %v982_v29  ;;  %v993_v36 = vunpack.i.l.bf16 %v992_v34  ;;  %v994_v38 = vunpack.i.h.bf16 %v992_v34 }
 0x229   : > { %652 = vmatpush.msra.mxu1 %v983_v30  ;;  %884 = vmatpush.msra.mxu2 %v983_v30 }
 0x22a   : > { %885 = vmatpush.msra.mxu3 %v983_v30 }
 0x22b   : > { %653 = vmatpush.msra.mxu1 %v984_v32  ;;  %886 = vmatpush.msra.mxu2 %v984_v32 }
 0x22c   : > { %887 = vmatpush.msra.mxu3 %v984_v32 }
 0x22d   : > { %654 = vmatpush.msra.mxu1 %v988_v33  ;;  %888 = vmatpush.msra.mxu2 %v988_v33 }
 0x22e   : > { %889 = vmatpush.msra.mxu3 %v988_v33  ;;  %v997_v37 = vpop.permute.xlu1 %996  ;;  %v592_v50 = vpop.permute.xlu0 %591 }
 0x22f   : > { %655 = vmatpush.msra.mxu1 %v989_v35  ;;  %890 = vmatpush.msra.mxu2 %v989_v35  ;;  %v998_v39 = vunpack.i.l.bf16 %v997_v37  ;;  %v999_v40 = vunpack.i.h.bf16 %v997_v37 }
 0x230   : > { %891 = vmatpush.msra.mxu3 %v989_v35 }
 0x231   : > { %656 = vmatpush.msra.mxu1 %v993_v36  ;;  %892 = vmatpush.msra.mxu2 %v993_v36 }
 0x232   : > { %893 = vmatpush.msra.mxu3 %v993_v36 }
 0x233   : > { %657 = vmatpush.msra.mxu1 %v994_v38  ;;  %894 = vmatpush.msra.mxu2 %v994_v38 }
 0x234   : > { %895 = vmatpush.msra.mxu3 %v994_v38 }
 0x235   : > { %658 = vmatpush.msra.mxu1 %v998_v39  ;;  %896 = vmatpush.msra.mxu2 %v998_v39 }
 0x236   : > { %897 = vmatpush.msra.mxu3 %v998_v39  ;;  %v607_v54 = vpop.permute.xlu0 %606  ;;  %v597_v62 = vpop.permute.xlu1 %596 }
 0x237   : > { %659 = vmatpush.msra.mxu1 %v999_v40  ;;  %898 = vmatpush.msra.mxu2 %v999_v40 }
 0x238   : > { %899 = vmatpush.msra.mxu3 %v999_v40 }
 0x239   : > { %866 = vmatpush.msk.msra.mxu1 %vm1131_vm7, %v524_v18  ;;  %900 = vmatpush.msk.msra.mxu2 %vm1131_vm7, %v524_v18 }
 0x23a   : > { %901 = vmatpush.msk.msra.mxu3 %vm1131_vm7, %v524_v18 }
 0x23b   : > { %867 = vmatpush.msk.msra.mxu1 %vm1131_vm7, %v1147_v16  ;;  %902 = vmatpush.msk.msra.mxu2 %vm1131_vm7, %v1147_v16 }
 0x23c   : > { %903 = vmatpush.msk.msra.mxu3 %vm1131_vm7, %v1147_v16 }
 0x23d   : > { %868 = vmatpush.msk.msra.mxu1 %vm1131_vm7, %v1135_v5  ;;  %904 = vmatpush.msk.msra.mxu2 %vm1131_vm7, %v1135_v5 }
 0x23e   : > { %905 = vmatpush.msk.msra.mxu3 %vm1131_vm7, %v1135_v5  ;;  %v622_v63 = vpop.permute.xlu0 %621  ;;  %v612_v6 = vpop.permute.xlu1 %611 }
 0x23f   : > { %869 = vmatpush.msk.msra.mxu1 %vm1131_vm7, %v1129_v2  ;;  %906 = vmatpush.msk.msra.mxu2 %vm1131_vm7, %v1129_v2 }
 0x240   : > { %907 = vmatpush.msk.msra.mxu3 %vm1131_vm7, %v1129_v2  ;;  %870 = vmatmul.msk.f32.vlgmr.msra.gmra.mxu1 %vm471_vm2, %v568_v41 }
 0x241   : > { %873 = vmatmul.msk.f32.vlgmr.msra.gmra.mxu2 %vm471_vm2, %v571_v42  ;;  %876 = vmatmul.msk.f32.vlgmr.msra.gmra.mxu3 %vm471_vm2, %v574_v43 }
 0x248   : > { %871 = vmatmul.msk.f32.gmra.mxu1 %vm471_vm2, %v569_v44 }
 0x249   : > { %874 = vmatmul.msk.f32.gmra.mxu2 %vm471_vm2, %v572_v45  ;;  %877 = vmatmul.msk.f32.gmra.mxu3 %vm471_vm2, %v575_v46 }
 0x250   : > { %872 = vmatmul.msk.f32.gmra.mxu1 %vm471_vm2, %v570_v47 }
 0x251   : > { %875 = vmatmul.msk.f32.gmra.mxu2 %vm471_vm2, %v573_v48 }
 0x2bd   : > { %v665_v52 = vpop.f32.mrf.mxu1 }
 0x2be   : > { %v666_v53 = vadd.f32 %v665_v52, %v587_v49 }
 0x2c0   : > { %690 = vst.msk [vmem:[%s356_s10] sm:$0xff] %vm689_vm10, %v666_v53 }
 0x2c4   : > { %v674_v56 = vpop.f32.mrf.mxu2  ;;  %v683_v57 = vpop.f32.mrf.mxu3 }
 0x2c5   : > { %v675_v58 = vadd.f32 %v674_v56, %v602_v51  ;;  %v684_v59 = vadd.f32 %v683_v57, %v617_v55  ;;  %v668_v60 = vpop.f32.mrf.mxu1 }
 0x2c6   : > { %v669_v61 = vadd.f32 %v668_v60, %v592_v50 }
 0x2c7   : > { %693 = vst.msk [vmem:[%s356_s10 + $0x18] sm:$0xff] %vm689_vm10, %v675_v58 }
 0x2c8   : > { %696 = vst.msk [vmem:[%s364_s12 + $0x10] sm:$0xff] %vm689_vm10, %v684_v59 }
 0x2c9   : > { %691 = vst.msk [vmem:[%s356_s10 + $0x8] sm:$0xff] %vm689_vm10, %v669_v61 }
 0x2cc   : > { %v677_v0 = vpop.f32.mrf.mxu2  ;;  %v686_v1 = vpop.f32.mrf.mxu3 }
 0x2cd   : > { %v678_v2 = vadd.f32 %v677_v0, %v607_v54  ;;  %v687_v3 = vadd.f32 %v686_v1, %v622_v63  ;;  %v671_v4 = vpop.f32.mrf.mxu1 }
 0x2ce   : > { %v672_v5 = vadd.f32 %v671_v4, %v597_v62 }
 0x2cf   : > { %694 = vst.msk [vmem:[%s364_s12] sm:$0xff] %vm689_vm10, %v678_v2 }
 0x2d0   : > { %697 = vst.msk [vmem:[%s364_s12 + $0x18] sm:$0xff] %vm689_vm10, %v687_v3 }
 0x2d1   : > { %692 = vst.msk [vmem:[%s356_s10 + $0x10] sm:$0xff] %vm689_vm10, %v672_v5 }
 0x2d4   : > { %v680_v7 = vpop.f32.mrf.mxu2 }
 0x2d5   : > { %v681_v8 = vadd.f32 %v680_v7, %v612_v6 }
 0x2d7   : > { %695 = vst.msk [vmem:[%s364_s12 + $0x8] sm:$0xff] %vm689_vm10, %v681_v8 }
 0x2d8 PF: > { %s18_s26 = sadd.s32 1, %s1022_s26   ;;  %s1278_s24 = smov %s1018_s25 }
 0x2d9   : > { %p15_p5 = scmp.ge.s32.totalorder %s18_s26, 4   ;;  %s1279_s25 = smov %s1281_s27 }
 0x2db   :  { %17 = sbr.rel (!%p15_p5) target bundleno = 2 (0x2), region = 89 }

</bundles_post_ra>
